<compile_context>
chip_gen: v5e
topology: v5e:2x2
jax: 0.10.0
libtpu: 0.0.40
codegen_flags: <defaults>
</compile_context>

<pallas_src>
import functools
import math

import jax
import jax.numpy as jnp
from jax import lax
from jax.experimental import pallas as pl
from jax.experimental.pallas import tpu as pltpu


def _pick_tile(dim, max_tile, align):
    """Full extent if it fits, else the largest `align`-multiple <= max_tile."""
    if dim <= max_tile:
        return dim
    return max(align, (max_tile // align) * align)


# ------------------------------------------------------------------
# Kernel 1: tiled linear   out = x @ W_t + b      (W_t already (Din, Dout))
# ------------------------------------------------------------------
def _linear_kernel(x_ref, wt_ref, b_ref, o_ref, *, matmul_dtype):
    x = x_ref[...].astype(matmul_dtype)
    w = wt_ref[...].astype(matmul_dtype)
    acc = jnp.dot(x, w, preferred_element_type=jnp.float32)
    o_ref[...] = (acc + b_ref[...]).astype(o_ref.dtype)


def pallas_linear(x2d, weight_t, bias, *, matmul_dtype=jnp.float32,
                  block_m=256, block_n=512):
    """x2d: (M, Din); weight_t: (Din, Dout) (pre-transposed); bias: (Dout,)."""
    M, Din = x2d.shape
    Dout = weight_t.shape[1]
    b2d = bias.reshape(1, Dout)

    tm = _pick_tile(M, block_m, 8)
    tn = _pick_tile(Dout, block_n, 128)
    grid = (pl.cdiv(M, tm), pl.cdiv(Dout, tn))

    kern = functools.partial(_linear_kernel, matmul_dtype=matmul_dtype)
    cost = pl.CostEstimate(
        flops=int(2 * M * Din * Dout),
        transcendentals=0,
        bytes_accessed=int(4 * (M * Din + Din * Dout + M * Dout + Dout)),
    )
    return pl.pallas_call(
        kern,
        out_shape=jax.ShapeDtypeStruct((M, Dout), jnp.float32),
        grid_spec=pl.GridSpec(
            grid=grid,
            in_specs=[
                pl.BlockSpec((tm, Din), lambda i, j: (i, 0)),
                pl.BlockSpec((Din, tn), lambda i, j: (0, j)),
                pl.BlockSpec((1, tn), lambda i, j: (0, j)),
            ],
            out_specs=pl.BlockSpec((tm, tn), lambda i, j: (i, j)),
        ),
        compiler_params=pltpu.CompilerParams(
            dimension_semantics=("parallel", "parallel"),
            vmem_limit_bytes=64 * 1024 * 1024,
        ),
        cost_estimate=cost,
    )(x2d, weight_t, b2d)


# ------------------------------------------------------------------
# Kernel 2: attention.  One grid step handles one (batch, q-tile); all heads are
# processed in-kernel from the lane-dense (N, W, D) projections, so no HBM-level
# head split/merge transposes are needed and the output store is D lanes wide.
# ------------------------------------------------------------------
def _mha_attn_kernel(q_ref, k_ref, v_ref, o_ref, w_ref, *,
                     n_heads, inv_scale, matmul_dtype):
    # q_ref: (1, tq, D); k_ref/v_ref: (1, W, D); o_ref: (1, tq, D); w_ref: (1, H, tq, W)
    q = q_ref[0] * inv_scale            # fold 1/scale into Q before QK^T
    k = k_ref[0]
    v = v_ref[0]
    d_head = q.shape[-1] // n_heads

    outs = []
    for h in range(n_heads):            # static unroll over heads (VMEM-local slices)
        sl = slice(h * d_head, (h + 1) * d_head)
        qh = q[:, sl].astype(matmul_dtype)
        kh = k[:, sl].astype(matmul_dtype)
        vh = v[:, sl].astype(matmul_dtype)
        # contract the last dims directly -> no explicit K transpose (frees XLU)
        s = lax.dot_general(qh, kh, dimension_numbers=(((1,), (1,)), ((), ())),
                            preferred_element_type=jnp.float32)        # (tq, W)
        s_max = jnp.max(s, axis=-1, keepdims=True)
        e = jnp.exp(s - s_max)
        denom = jnp.sum(e, axis=-1, keepdims=True)
        p = e * pl.reciprocal(denom, approx=True)                      # EUP vrcp
        w_ref[0, h] = p.astype(w_ref.dtype)
        outs.append(jnp.dot(p.astype(matmul_dtype), vh,
                            preferred_element_type=jnp.float32))       # (tq, Dh)
    # single lane-dense store of the merged-head output (full D width)
    o_ref[0] = jnp.concatenate(outs, axis=-1).astype(o_ref.dtype)
    # TODO(synk): boolean `mask` branch (attention_score[mask] = 1e-10) not implemented;
    #             only the mask=None path of the reference module is supported.


def pallas_attention(q, k, v, n_heads, inv_scale, *,
                     matmul_dtype=jnp.float32, block_q=256):
    """q/k/v: (N, W, D) merged-head projections.
    Returns (attention merged to (N, W, D), weights (N, H, W, W))."""
    N, W, D = q.shape
    d_head = D // n_heads
    tq = _pick_tile(W, block_q, 8)
    grid = (N, pl.cdiv(W, tq))

    kern = functools.partial(_mha_attn_kernel, n_heads=n_heads,
                             inv_scale=inv_scale, matmul_dtype=matmul_dtype)
    q_spec = pl.BlockSpec((1, tq, D), lambda n, qi: (n, qi, 0))
    kv_spec = pl.BlockSpec((1, W, D), lambda n, qi: (n, 0, 0))
    o_spec = pl.BlockSpec((1, tq, D), lambda n, qi: (n, qi, 0))
    w_spec = pl.BlockSpec((1, n_heads, tq, W), lambda n, qi: (n, 0, qi, 0))

    cost = pl.CostEstimate(
        flops=int(4 * N * n_heads * W * W * d_head),
        transcendentals=int(N * n_heads * W * W),
        bytes_accessed=int(4 * (4 * N * W * D + N * n_heads * W * W)),
    )
    # TODO(synk): full flash-style key-axis tiling is blocked by the module's
    #             requirement to return the dense (N, H, W, W) attention_weights.
    return pl.pallas_call(
        kern,
        out_shape=(
            jax.ShapeDtypeStruct((N, W, D), jnp.float32),
            jax.ShapeDtypeStruct((N, n_heads, W, W), jnp.float32),
        ),
        grid_spec=pl.GridSpec(
            grid=grid,
            in_specs=[q_spec, kv_spec, kv_spec],
            out_specs=(o_spec, w_spec),
        ),
        compiler_params=pltpu.CompilerParams(
            dimension_semantics=("parallel", "parallel"),
            vmem_limit_bytes=64 * 1024 * 1024,
        ),
        cost_estimate=cost,
    )(q, k, v)


# ------------------------------------------------------------------
# Parameter init (deterministic, PyTorch nn.Linear-style uniform init).
# Weights stored PRE-TRANSPOSED as (Din, Dout) so no per-forward W.T copy.
# ------------------------------------------------------------------
def init_mha_params(key, d_model):
    bound = 1.0 / math.sqrt(d_model)
    params = {}
    for name in ("fc_q", "fc_k", "fc_v", "fc_o"):
        key, kw, kb = jax.random.split(key, 3)
        params[name] = {
            "weight_t": jax.random.uniform(kw, (d_model, d_model), jnp.float32,
                                           -bound, bound),
            "bias": jax.random.uniform(kb, (d_model,), jnp.float32, -bound, bound),
        }
    return params


# ------------------------------------------------------------------
# Forward pass (mask=None path of the PyTorch module)
# ------------------------------------------------------------------
def mha_forward(params, Q, K, V, n_heads, *, matmul_dtype=jnp.float32, block_q=256):
    N, W, D = Q.shape
    assert D % n_heads == 0
    inv_scale = 1.0 / math.sqrt(D / n_heads)   # scale = sqrt(d_model / n_heads)

    def proj(x, p):
        y = pallas_linear(x.reshape(N * W, D), p["weight_t"], p["bias"],
                          matmul_dtype=matmul_dtype)
        return y.reshape(N, W, D)

    q = proj(Q, params["fc_q"])
    k = proj(K, params["fc_k"])
    v = proj(V, params["fc_v"])

    attn, attn_weights = pallas_attention(q, k, v, n_heads, inv_scale,
                                          matmul_dtype=matmul_dtype, block_q=block_q)

    x = pallas_linear(attn.reshape(N * W, D), params["fc_o"]["weight_t"],
                      params["fc_o"]["bias"],
                      matmul_dtype=matmul_dtype).reshape(N, W, D)
    return x, attn_weights


def mha_reference(params, Q, K, V, n_heads):
    """Pure-JAX reference matching the PyTorch module (mask=None path)."""
    N, W, D = Q.shape
    Dh = D // n_heads
    scale = math.sqrt(D / n_heads)
    lin = lambda x, p: x @ p["weight_t"] + p["bias"]
    q = lin(Q, params["fc_q"]).reshape(N, W, n_heads, Dh).transpose(0, 2, 1, 3)
    k = lin(K, params["fc_k"]).reshape(N, W, n_heads, Dh).transpose(0, 2, 1, 3)
    v = lin(V, params["fc_v"]).reshape(N, W, n_heads, Dh).transpose(0, 2, 1, 3)
    s = jnp.einsum("nhqd,nhkd->nhqk", q, k) / scale
    w = jax.nn.softmax(s, axis=-1)
    a = jnp.einsum("nhqk,nhkd->nhqd", w, v)
    x = a.transpose(0, 2, 1, 3).reshape(N, W, D)
    return lin(x, params["fc_o"]), w


# ------------------------------------------------------------------
if __name__ == "__main__":
    key = jax.random.PRNGKey(0)
    d_model, n_heads = 32, 4
    N, W = 2, 8

    kp, kq, kk, kv = jax.random.split(key, 4)
    params = init_mha_params(kp, d_model)
    Q = jax.random.normal(kq, (N, W, d_model), jnp.float32)
    K = jax.random.normal(kk, (N, W, d_model), jnp.float32)
    V = jax.random.normal(kv, (N, W, d_model), jnp.float32)

    fwd = jax.jit(mha_forward, static_argnames=("n_heads", "matmul_dtype", "block_q"))

    # f32 MXU-operand path (matches PyTorch reference up to approx-reciprocal error)
    x, attn_w = fwd(params, Q, K, V, n_heads=n_heads)
    jax.block_until_ready((x, attn_w))

    x_ref, w_ref = mha_reference(params, Q, K, V, n_heads)
    assert x.shape == (N, W, d_model)
    assert attn_w.shape == (N, n_heads, W, W)
    assert jnp.allclose(jnp.sum(attn_w, axis=-1), 1.0, atol=1e-2)
    assert jnp.allclose(attn_w, w_ref, atol=2e-2, rtol=2e-2)
    assert jnp.allclose(x, x_ref, atol=2e-2, rtol=2e-2)

    # bf16 MXU-operand fast path (v5e/v6e/v7x); softmax stats + accumulation stay f32
    x_bf, w_bf = fwd(params, Q, K, V, n_heads=n_heads, matmul_dtype=jnp.bfloat16)
    jax.block_until_ready((x_bf, w_bf))
    assert bool(jnp.all(jnp.isfinite(x_bf))) and bool(jnp.all(jnp.isfinite(w_bf)))
    assert jnp.allclose(jnp.sum(w_bf, axis=-1), 1.0, atol=3e-2)

    print("KERNEL_OK")
</pallas_src>

<mosaic_0001>
module attributes {stable_mosaic.version = 11 : i64} {
  func.func @_linear_kernel(%arg0: i32, %arg1: i32, %arg2: memref<16x32xf32, #tpu.memory_space<vmem>>, %arg3: memref<32x32xf32, #tpu.memory_space<vmem>>, %arg4: memref<1x32xf32, #tpu.memory_space<vmem>>, %arg5: memref<16x32xf32, #tpu.memory_space<vmem>>) attributes {dimension_semantics = [#tpu.dimension_semantics<parallel>, #tpu.dimension_semantics<parallel>], iteration_bounds = array<i64: 1, 1>, scalar_prefetch = 0 : i64, scratch_operands = 0 : i64, tpu.core_type = #tpu.core_type<tc>, window_params = [{transform_indices = @transform_0, window_bounds = array<i64: 16, 32>}, {transform_indices = @transform_1, window_bounds = array<i64: 32, 32>}, {transform_indices = @transform_2, window_bounds = array<i64: 1, 32>}, {transform_indices = @transform_3, window_bounds = array<i64: 16, 32>}]} {
    %c0 = arith.constant 0 : index
    %c0_0 = arith.constant 0 : index
    %0 = vector.load %arg2[%c0, %c0_0] : memref<16x32xf32, #tpu.memory_space<vmem>>, vector<16x32xf32>
    %c0_1 = arith.constant 0 : index
    %c0_2 = arith.constant 0 : index
    %1 = vector.load %arg3[%c0_1, %c0_2] : memref<32x32xf32, #tpu.memory_space<vmem>>, vector<32x32xf32>
    %cst = arith.constant dense<0.000000e+00> : vector<16x32xf32>
    %2 = tpu.matmul %0, %1, %cst {dimension_numbers = #tpu.dot_dimension_numbers<[1], [0], [0], [1], [0, 0, 1, 1], [], []>} : vector<16x32xf32>, vector<32x32xf32>, vector<16x32xf32> -> vector<16x32xf32>
    %c0_3 = arith.constant 0 : index
    %c0_4 = arith.constant 0 : index
    %3 = vector.load %arg4[%c0_3, %c0_4] : memref<1x32xf32, #tpu.memory_space<vmem>>, vector<1x32xf32>
    %4 = vector.broadcast %3 : vector<1x32xf32> to vector<16x32xf32>
    %5 = arith.addf %2, %4 : vector<16x32xf32>
    %c0_5 = arith.constant 0 : index
    %c0_6 = arith.constant 0 : index
    %6 = vector.load %arg5[%c0_5, %c0_6] : memref<16x32xf32, #tpu.memory_space<vmem>>, vector<16x32xf32>
    tpu.vector_store %arg5[%c0_5, %c0_6], %5 {strides = array<i32>} : memref<16x32xf32, #tpu.memory_space<vmem>>, vector<16x32xf32>,
    return
  }
  func.func @transform_0(%arg0: i32, %arg1: i32) -> (i32, i32) {
    %c0_i32 = arith.constant 0 : i32
    %c0_i32_0 = arith.constant 0 : i32
    return %arg0, %c0_i32 : i32, i32
  }
  func.func @transform_1(%arg0: i32, %arg1: i32) -> (i32, i32) {
    %c0_i32 = arith.constant 0 : i32
    %c0_i32_0 = arith.constant 0 : i32
    return %c0_i32, %arg1 : i32, i32
  }
  func.func @transform_2(%arg0: i32, %arg1: i32) -> (i32, i32) {
    %c0_i32 = arith.constant 0 : i32
    %c0_i32_0 = arith.constant 0 : i32
    return %c0_i32, %arg1 : i32, i32
  }
  func.func @transform_3(%arg0: i32, %arg1: i32) -> (i32, i32) {
    %c0_i32 = arith.constant 0 : i32
    return %arg0, %arg1 : i32, i32
  }
}

module attributes {stable_mosaic.version = 11 : i64} {
  func.func @_linear_kernel(%arg0: i32, %arg1: i32, %arg2: memref<16x32xf32, #tpu.memory_space<vmem>>, %arg3: memref<32x32xf32, #tpu.memory_space<vmem>>, %arg4: memref<1x32xf32, #tpu.memory_space<vmem>>, %arg5: memref<16x32xf32, #tpu.memory_space<vmem>>) attributes {dimension_semantics = [#tpu.dimension_semantics<parallel>, #tpu.dimension_semantics<parallel>], iteration_bounds = array<i64: 1, 1>, scalar_prefetch = 0 : i64, scratch_operands = 0 : i64, tpu.core_type = #tpu.core_type<tc>, window_params = [{transform_indices = @transform_0, window_bounds = array<i64: 16, 32>}, {transform_indices = @transform_1, window_bounds = array<i64: 32, 32>}, {transform_indices = @transform_2, window_bounds = array<i64: 1, 32>}, {transform_indices = @transform_3, window_bounds = array<i64: 16, 32>}]} {
    %c0 = arith.constant 0 : index
    %c0_0 = arith.constant 0 : index
    %0 = vector.load %arg2[%c0, %c0_0] : memref<16x32xf32, #tpu.memory_space<vmem>>, vector<16x32xf32>
    %c0_1 = arith.constant 0 : index
    %c0_2 = arith.constant 0 : index
    %1 = vector.load %arg3[%c0_1, %c0_2] : memref<32x32xf32, #tpu.memory_space<vmem>>, vector<32x32xf32>
    %cst = arith.constant dense<0.000000e+00> : vector<16x32xf32>
    %2 = tpu.matmul %0, %1, %cst {dimension_numbers = #tpu.dot_dimension_numbers<[1], [0], [0], [1], [0, 0, 1, 1], [], []>} : vector<16x32xf32>, vector<32x32xf32>, vector<16x32xf32> -> vector<16x32xf32>
    %c0_3 = arith.constant 0 : index
    %c0_4 = arith.constant 0 : index
    %3 = vector.load %arg4[%c0_3, %c0_4] : memref<1x32xf32, #tpu.memory_space<vmem>>, vector<1x32xf32>
    %4 = vector.broadcast %3 : vector<1x32xf32> to vector<16x32xf32>
    %5 = arith.addf %2, %4 : vector<16x32xf32>
    %c0_5 = arith.constant 0 : index
    %c0_6 = arith.constant 0 : index
    %6 = vector.load %arg5[%c0_5, %c0_6] : memref<16x32xf32, #tpu.memory_space<vmem>>, vector<16x32xf32>
    tpu.vector_store %arg5[%c0_5, %c0_6], %5 {strides = array<i32>} : memref<16x32xf32, #tpu.memory_space<vmem>>, vector<16x32xf32>,
    return
  }
  func.func @transform_0(%arg0: i32, %arg1: i32) -> (i32, i32) {
    %c0_i32 = arith.constant 0 : i32
    %c0_i32_0 = arith.constant 0 : i32
    return %arg0, %c0_i32 : i32, i32
  }
  func.func @transform_1(%arg0: i32, %arg1: i32) -> (i32, i32) {
    %c0_i32 = arith.constant 0 : i32
    %c0_i32_0 = arith.constant 0 : i32
    return %c0_i32, %arg1 : i32, i32
  }
  func.func @transform_2(%arg0: i32, %arg1: i32) -> (i32, i32) {
    %c0_i32 = arith.constant 0 : i32
    %c0_i32_0 = arith.constant 0 : i32
    return %c0_i32, %arg1 : i32, i32
  }
  func.func @transform_3(%arg0: i32, %arg1: i32) -> (i32, i32) {
    %c0_i32 = arith.constant 0 : i32
    return %arg0, %arg1 : i32, i32
  }
}

module attributes {stable_mosaic.version = 11 : i64} {
  func.func @_mha_attn_kernel(%arg0: i32, %arg1: i32, %arg2: memref<1x8x32xf32, #tpu.memory_space<vmem>>, %arg3: memref<1x8x32xf32, #tpu.memory_space<vmem>>, %arg4: memref<1x8x32xf32, #tpu.memory_space<vmem>>, %arg5: memref<1x8x32xf32, #tpu.memory_space<vmem>>, %arg6: memref<1x4x8x8xf32, #tpu.memory_space<vmem>>) attributes {dimension_semantics = [#tpu.dimension_semantics<parallel>, #tpu.dimension_semantics<parallel>], iteration_bounds = array<i64: 2, 1>, scalar_prefetch = 0 : i64, scratch_operands = 0 : i64, tpu.core_type = #tpu.core_type<tc>, window_params = [{transform_indices = @transform_0, window_bounds = array<i64: 1, 8, 32>}, {transform_indices = @transform_1, window_bounds = array<i64: 1, 8, 32>}, {transform_indices = @transform_2, window_bounds = array<i64: 1, 8, 32>}, {transform_indices = @transform_3, window_bounds = array<i64: 1, 8, 32>}, {transform_indices = @transform_4, window_bounds = array<i64: 1, 4, 8, 8>}]} {
    %c0 = arith.constant 0 : index
    %c0_0 = arith.constant 0 : index
    %c0_1 = arith.constant 0 : index
    %0 = vector.load %arg2[%c0, %c0_0, %c0_1] : memref<1x8x32xf32, #tpu.memory_space<vmem>>, vector<1x8x32xf32>
    %1 = vector.shape_cast %0 : vector<1x8x32xf32> to vector<8x32xf32>
    %cst = arith.constant 0.353553385 : f32
    %2 = vector.broadcast %cst : f32 to vector<8x32xf32>
    %3 = arith.mulf %1, %2 : vector<8x32xf32>
    %c0_2 = arith.constant 0 : index
    %c0_3 = arith.constant 0 : index
    %c0_4 = arith.constant 0 : index
    %4 = vector.load %arg3[%c0_2, %c0_3, %c0_4] : memref<1x8x32xf32, #tpu.memory_space<vmem>>, vector<1x8x32xf32>
    %5 = vector.shape_cast %4 : vector<1x8x32xf32> to vector<8x32xf32>
    %c0_5 = arith.constant 0 : index
    %c0_6 = arith.constant 0 : index
    %c0_7 = arith.constant 0 : index
    %6 = vector.load %arg4[%c0_5, %c0_6, %c0_7] : memref<1x8x32xf32, #tpu.memory_space<vmem>>, vector<1x8x32xf32>
    %7 = vector.shape_cast %6 : vector<1x8x32xf32> to vector<8x32xf32>
    %8 = vector.extract_strided_slice %3 {offsets = [0, 0], sizes = [8, 8], strides = [1, 1]} : vector<8x32xf32> to vector<8x8xf32>
    %9 = vector.extract_strided_slice %5 {offsets = [0, 0], sizes = [8, 8], strides = [1, 1]} : vector<8x32xf32> to vector<8x8xf32>
    %10 = vector.extract_strided_slice %7 {offsets = [0, 0], sizes = [8, 8], strides = [1, 1]} : vector<8x32xf32> to vector<8x8xf32>
    %cst_8 = arith.constant dense<0.000000e+00> : vector<8x8xf32>
    %11 = tpu.matmul %8, %9, %cst_8 {dimension_numbers = #tpu.dot_dimension_numbers<[1], [1], [0], [0], [0, 0, 1, 0], [], []>} : vector<8x8xf32>, vector<8x8xf32>, vector<8x8xf32> -> vector<8x8xf32>
    %cst_9 = arith.constant dense<0xFF800000> : vector<8xf32>
    %12 = vector.multi_reduction <maximumf>, %11, %cst_9 [1] : vector<8x8xf32> to vector<8xf32>
    %13 = vector.shape_cast %12 : vector<8xf32> to vector<8x1xf32>
    %14 = vector.broadcast %13 : vector<8x1xf32> to vector<8x8xf32>
    %15 = arith.subf %11, %14 : vector<8x8xf32>
    %16 = math.exp %15 : vector<8x8xf32>
    %cst_10 = arith.constant dense<0.000000e+00> : vector<8xf32>
    %17 = vector.multi_reduction <add>, %16, %cst_10 [1] : vector<8x8xf32> to vector<8xf32>
    %18 = vector.shape_cast %17 : vector<8xf32> to vector<8x1xf32>
    %19 = tpu.reciprocal %18 {approx = true} : vector<8x1xf32> -> vector<8x1xf32>
    %20 = vector.broadcast %19 : vector<8x1xf32> to vector<8x8xf32>
    %21 = arith.mulf %16, %20 : vector<8x8xf32>
    %c0_11 = arith.constant 0 : index
    %c0_12 = arith.constant 0 : index
    %c0_13 = arith.constant 0 : index
    %c0_14 = arith.constant 0 : index
    %22 = vector.load %arg6[%c0_11, %c0_12, %c0_13, %c0_14] : memref<1x4x8x8xf32, #tpu.memory_space<vmem>>, vector<1x1x8x8xf32>
    %23 = vector.shape_cast %22 : vector<1x1x8x8xf32> to vector<8x8xf32>
    %24 = vector.shape_cast %21 : vector<8x8xf32> to vector<1x1x8x8xf32>
    tpu.vector_store %arg6[%c0_11, %c0_12, %c0_13, %c0_14], %24 {strides = array<i32>} : memref<1x4x8x8xf32, #tpu.memory_space<vmem>>, vector<1x1x8x8xf32>,
    %cst_15 = arith.constant dense<0.000000e+00> : vector<8x8xf32>
    %25 = tpu.matmul %21, %10, %cst_15 {dimension_numbers = #tpu.dot_dimension_numbers<[1], [0], [0], [1], [0, 0, 1, 1], [], []>} : vector<8x8xf32>, vector<8x8xf32>, vector<8x8xf32> -> vector<8x8xf32>
    %26 = vector.extract_strided_slice %3 {offsets = [0, 8], sizes = [8, 8], strides = [1, 1]} : vector<8x32xf32> to vector<8x8xf32>
    %27 = vector.extract_strided_slice %5 {offsets = [0, 8], sizes = [8, 8], strides = [1, 1]} : vector<8x32xf32> to vector<8x8xf32>
    %28 = vector.extract_strided_slice %7 {offsets = [0, 8], sizes = [8, 8], strides = [1, 1]} : vector<8x32xf32> to vector<8x8xf32>
    %cst_16 = arith.constant dense<0.000000e+00> : vector<8x8xf32>
    %29 = tpu.matmul %26, %27, %cst_16 {dimension_numbers = #tpu.dot_dimension_numbers<[1], [1], [0], [0], [0, 0, 1, 0], [], []>} : vector<8x8xf32>, vector<8x8xf32>, vector<8x8xf32> -> vector<8x8xf32>
    %cst_17 = arith.constant dense<0xFF800000> : vector<8xf32>
    %30 = vector.multi_reduction <maximumf>, %29, %cst_17 [1] : vector<8x8xf32> to vector<8xf32>
    %31 = vector.shape_cast %30 : vector<8xf32> to vector<8x1xf32>
    %32 = vector.broadcast %31 : vector<8x1xf32> to vector<8x8xf32>
    %33 = arith.subf %29, %32 : vector<8x8xf32>
    %34 = math.exp %33 : vector<8x8xf32>
    %cst_18 = arith.constant dense<0.000000e+00> : vector<8xf32>
    %35 = vector.multi_reduction <add>, %34, %cst_18 [1] : vector<8x8xf32> to vector<8xf32>
    %36 = vector.shape_cast %35 : vector<8xf32> to vector<8x1xf32>
    %37 = tpu.reciprocal %36 {approx = true} : vector<8x1xf32> -> vector<8x1xf32>
    %38 = vector.broadcast %37 : vector<8x1xf32> to vector<8x8xf32>
    %39 = arith.mulf %34, %38 : vector<8x8xf32>
    %c0_19 = arith.constant 0 : index
    %c1 = arith.constant 1 : index
    %c0_20 = arith.constant 0 : index
    %c0_21 = arith.constant 0 : index
    %40 = vector.load %arg6[%c0_19, %c1, %c0_20, %c0_21] : memref<1x4x8x8xf32, #tpu.memory_space<vmem>>, vector<1x1x8x8xf32>
    %41 = vector.shape_cast %40 : vector<1x1x8x8xf32> to vector<8x8xf32>
    %42 = vector.shape_cast %39 : vector<8x8xf32> to vector<1x1x8x8xf32>
    tpu.vector_store %arg6[%c0_19, %c1, %c0_20, %c0_21], %42 {strides = array<i32>} : memref<1x4x8x8xf32, #tpu.memory_space<vmem>>, vector<1x1x8x8xf32>,
    %cst_22 = arith.constant dense<0.000000e+00> : vector<8x8xf32>
    %43 = tpu.matmul %39, %28, %cst_22 {dimension_numbers = #tpu.dot_dimension_numbers<[1], [0], [0], [1], [0, 0, 1, 1], [], []>} : vector<8x8xf32>, vector<8x8xf32>, vector<8x8xf32> -> vector<8x8xf32>
    %44 = vector.extract_strided_slice %3 {offsets = [0, 16], sizes = [8, 8], strides = [1, 1]} : vector<8x32xf32> to vector<8x8xf32>
    %45 = vector.extract_strided_slice %5 {offsets = [0, 16], sizes = [8, 8], strides = [1, 1]} : vector<8x32xf32> to vector<8x8xf32>
    %46 = vector.extract_strided_slice %7 {offsets = [0, 16], sizes = [8, 8], strides = [1, 1]} : vector<8x32xf32> to vector<8x8xf32>
    %cst_23 = arith.constant dense<0.000000e+00> : vector<8x8xf32>
    %47 = tpu.matmul %44, %45, %cst_23 {dimension_numbers = #tpu.dot_dimension_numbers<[1], [1], [0], [0], [0, 0, 1, 0], [], []>} : vector<8x8xf32>, vector<8x8xf32>, vector<8x8xf32> -> vector<8x8xf32>
    %cst_24 = arith.constant dense<0xFF800000> : vector<8xf32>
    %48 = vector.multi_reduction <maximumf>, %47, %cst_24 [1] : vector<8x8xf32> to vector<8xf32>
    %49 = vector.shape_cast %48 : vector<8xf32> to vector<8x1xf32>
    %50 = vector.broadcast %49 : vector<8x1xf32> to vector<8x8xf32>
    %51 = arith.subf %47, %50 : vector<8x8xf32>
    %52 = math.exp %51 : vector<8x8xf32>
    %cst_25 = arith.constant dense<0.000000e+00> : vector<8xf32>
    %53 = vector.multi_reduction <add>, %52, %cst_25 [1] : vector<8x8xf32> to vector<8xf32>
    %54 = vector.shape_cast %53 : vector<8xf32> to vector<8x1xf32>
    %55 = tpu.reciprocal %54 {approx = true} : vector<8x1xf32> -> vector<8x1xf32>
    %56 = vector.broadcast %55 : vector<8x1xf32> to vector<8x8xf32>
    %57 = arith.mulf %52, %56 : vector<8x8xf32>
    %c0_26 = arith.constant 0 : index
    %c2 = arith.constant 2 : index
    %c0_27 = arith.constant 0 : index
    %c0_28 = arith.constant 0 : index
    %58 = vector.load %arg6[%c0_26, %c2, %c0_27, %c0_28] : memref<1x4x8x8xf32, #tpu.memory_space<vmem>>, vector<1x1x8x8xf32>
    %59 = vector.shape_cast %58 : vector<1x1x8x8xf32> to vector<8x8xf32>
    %60 = vector.shape_cast %57 : vector<8x8xf32> to vector<1x1x8x8xf32>
    tpu.vector_store %arg6[%c0_26, %c2, %c0_27, %c0_28], %60 {strides = array<i32>} : memref<1x4x8x8xf32, #tpu.memory_space<vmem>>, vector<1x1x8x8xf32>,
    %cst_29 = arith.constant dense<0.000000e+00> : vector<8x8xf32>
    %61 = tpu.matmul %57, %46, %cst_29 {dimension_numbers = #tpu.dot_dimension_numbers<[1], [0], [0], [1], [0, 0, 1, 1], [], []>} : vector<8x8xf32>, vector<8x8xf32>, vector<8x8xf32> -> vector<8x8xf32>
    %62 = vector.extract_strided_slice %3 {offsets = [0, 24], sizes = [8, 8], strides = [1, 1]} : vector<8x32xf32> to vector<8x8xf32>
    %63 = vector.extract_strided_slice %5 {offsets = [0, 24], sizes = [8, 8], strides = [1, 1]} : vector<8x32xf32> to vector<8x8xf32>
    %64 = vector.extract_strided_slice %7 {offsets = [0, 24], sizes = [8, 8], strides = [1, 1]} : vector<8x32xf32> to vector<8x8xf32>
    %cst_30 = arith.constant dense<0.000000e+00> : vector<8x8xf32>
    %65 = tpu.matmul %62, %63, %cst_30 {dimension_numbers = #tpu.dot_dimension_numbers<[1], [1], [0], [0], [0, 0, 1, 0], [], []>} : vector<8x8xf32>, vector<8x8xf32>, vector<8x8xf32> -> vector<8x8xf32>
    %cst_31 = arith.constant dense<0xFF800000> : vector<8xf32>
    %66 = vector.multi_reduction <maximumf>, %65, %cst_31 [1] : vector<8x8xf32> to vector<8xf32>
    %67 = vector.shape_cast %66 : vector<8xf32> to vector<8x1xf32>
    %68 = vector.broadcast %67 : vector<8x1xf32> to vector<8x8xf32>
    %69 = arith.subf %65, %68 : vector<8x8xf32>
    %70 = math.exp %69 : vector<8x8xf32>
    %cst_32 = arith.constant dense<0.000000e+00> : vector<8xf32>
    %71 = vector.multi_reduction <add>, %70, %cst_32 [1] : vector<8x8xf32> to vector<8xf32>
    %72 = vector.shape_cast %71 : vector<8xf32> to vector<8x1xf32>
    %73 = tpu.reciprocal %72 {approx = true} : vector<8x1xf32> -> vector<8x1xf32>
    %74 = vector.broadcast %73 : vector<8x1xf32> to vector<8x8xf32>
    %75 = arith.mulf %70, %74 : vector<8x8xf32>
    %c0_33 = arith.constant 0 : index
    %c3 = arith.constant 3 : index
    %c0_34 = arith.constant 0 : index
    %c0_35 = arith.constant 0 : index
    %76 = vector.load %arg6[%c0_33, %c3, %c0_34, %c0_35] : memref<1x4x8x8xf32, #tpu.memory_space<vmem>>, vector<1x1x8x8xf32>
    %77 = vector.shape_cast %76 : vector<1x1x8x8xf32> to vector<8x8xf32>
    %78 = vector.shape_cast %75 : vector<8x8xf32> to vector<1x1x8x8xf32>
    tpu.vector_store %arg6[%c0_33, %c3, %c0_34, %c0_35], %78 {strides = array<i32>} : memref<1x4x8x8xf32, #tpu.memory_space<vmem>>, vector<1x1x8x8xf32>,
    %cst_36 = arith.constant dense<0.000000e+00> : vector<8x8xf32>
    %79 = tpu.matmul %75, %64, %cst_36 {dimension_numbers = #tpu.dot_dimension_numbers<[1], [0], [0], [1], [0, 0, 1, 1], [], []>} : vector<8x8xf32>, vector<8x8xf32>, vector<8x8xf32> -> vector<8x8xf32>
    %80 = tpu.concatenate %25, %43, %61, %79 in 1 : vector<8x8xf32>, vector<8x8xf32>, vector<8x8xf32>, vector<8x8xf32> -> vector<8x32xf32>
    %c0_37 = arith.constant 0 : index
    %c0_38 = arith.constant 0 : index
    %c0_39 = arith.constant 0 : index
    %81 = vector.load %arg5[%c0_37, %c0_38, %c0_39] : memref<1x8x32xf32, #tpu.memory_space<vmem>>, vector<1x8x32xf32>
    %82 = vector.shape_cast %81 : vector<1x8x32xf32> to vector<8x32xf32>
    %83 = vector.shape_cast %80 : vector<8x32xf32> to vector<1x8x32xf32>
    tpu.vector_store %arg5[%c0_37, %c0_38, %c0_39], %83 {strides = array<i32>} : memref<1x8x32xf32, #tpu.memory_space<vmem>>, vector<1x8x32xf32>,
    return
  }
  func.func @transform_0(%arg0: i32, %arg1: i32) -> (i32, i32, i32) {
    %c0_i32 = arith.constant 0 : i32
    %c0_i32_0 = arith.constant 0 : i32
    return %arg0, %arg1, %c0_i32 : i32, i32, i32
  }
  func.func @transform_1(%arg0: i32, %arg1: i32) -> (i32, i32, i32) {
    %c0_i32 = arith.constant 0 : i32
    %c0_i32_0 = arith.constant 0 : i32
    %c0_i32_1 = arith.constant 0 : i32
    return %arg0, %c0_i32, %c0_i32_0 : i32, i32, i32
  }
  func.func @transform_2(%arg0: i32, %arg1: i32) -> (i32, i32, i32) {
    %c0_i32 = arith.constant 0 : i32
    %c0_i32_0 = arith.constant 0 : i32
    %c0_i32_1 = arith.constant 0 : i32
    return %arg0, %c0_i32, %c0_i32_0 : i32, i32, i32
  }
  func.func @transform_3(%arg0: i32, %arg1: i32) -> (i32, i32, i32) {
    %c0_i32 = arith.constant 0 : i32
    %c0_i32_0 = arith.constant 0 : i32
    return %arg0, %arg1, %c0_i32 : i32, i32, i32
  }
  func.func @transform_4(%arg0: i32, %arg1: i32) -> (i32, i32, i32, i32) {
    %c0_i32 = arith.constant 0 : i32
    %c0_i32_0 = arith.constant 0 : i32
    %c0_i32_1 = arith.constant 0 : i32
    return %arg0, %c0_i32, %arg1, %c0_i32_0 : i32, i32, i32, i32
  }
}

module attributes {stable_mosaic.version = 11 : i64} {
  func.func @_linear_kernel(%arg0: i32, %arg1: i32, %arg2: memref<16x32xf32, #tpu.memory_space<vmem>>, %arg3: memref<32x32xf32, #tpu.memory_space<vmem>>, %arg4: memref<1x32xf32, #tpu.memory_space<vmem>>, %arg5: memref<16x32xf32, #tpu.memory_space<vmem>>) attributes {dimension_semantics = [#tpu.dimension_semantics<parallel>, #tpu.dimension_semantics<parallel>], iteration_bounds = array<i64: 1, 1>, scalar_prefetch = 0 : i64, scratch_operands = 0 : i64, tpu.core_type = #tpu.core_type<tc>, window_params = [{transform_indices = @transform_0, window_bounds = array<i64: 16, 32>}, {transform_indices = @transform_1, window_bounds = array<i64: 32, 32>}, {transform_indices = @transform_2, window_bounds = array<i64: 1, 32>}, {transform_indices = @transform_3, window_bounds = array<i64: 16, 32>}]} {
    %c0 = arith.constant 0 : index
    %c0_0 = arith.constant 0 : index
    %0 = vector.load %arg2[%c0, %c0_0] : memref<16x32xf32, #tpu.memory_space<vmem>>, vector<16x32xf32>
    %c0_1 = arith.constant 0 : index
    %c0_2 = arith.constant 0 : index
    %1 = vector.load %arg3[%c0_1, %c0_2] : memref<32x32xf32, #tpu.memory_space<vmem>>, vector<32x32xf32>
    %cst = arith.constant dense<0.000000e+00> : vector<16x32xf32>
    %2 = tpu.matmul %0, %1, %cst {dimension_numbers = #tpu.dot_dimension_numbers<[1], [0], [0], [1], [0, 0, 1, 1], [], []>} : vector<16x32xf32>, vector<32x32xf32>, vector<16x32xf32> -> vector<16x32xf32>
    %c0_3 = arith.constant 0 : index
    %c0_4 = arith.constant 0 : index
    %3 = vector.load %arg4[%c0_3, %c0_4] : memref<1x32xf32, #tpu.memory_space<vmem>>, vector<1x32xf32>
    %4 = vector.broadcast %3 : vector<1x32xf32> to vector<16x32xf32>
    %5 = arith.addf %2, %4 : vector<16x32xf32>
    %c0_5 = arith.constant 0 : index
    %c0_6 = arith.constant 0 : index
    %6 = vector.load %arg5[%c0_5, %c0_6] : memref<16x32xf32, #tpu.memory_space<vmem>>, vector<16x32xf32>
    tpu.vector_store %arg5[%c0_5, %c0_6], %5 {strides = array<i32>} : memref<16x32xf32, #tpu.memory_space<vmem>>, vector<16x32xf32>,
    return
  }
  func.func @transform_0(%arg0: i32, %arg1: i32) -> (i32, i32) {
    %c0_i32 = arith.constant 0 : i32
    %c0_i32_0 = arith.constant 0 : i32
    return %arg0, %c0_i32 : i32, i32
  }
  func.func @transform_1(%arg0: i32, %arg1: i32) -> (i32, i32) {
    %c0_i32 = arith.constant 0 : i32
    %c0_i32_0 = arith.constant 0 : i32
    return %c0_i32, %arg1 : i32, i32
  }
  func.func @transform_2(%arg0: i32, %arg1: i32) -> (i32, i32) {
    %c0_i32 = arith.constant 0 : i32
    %c0_i32_0 = arith.constant 0 : i32
    return %c0_i32, %arg1 : i32, i32
  }
  func.func @transform_3(%arg0: i32, %arg1: i32) -> (i32, i32) {
    %c0_i32 = arith.constant 0 : i32
    return %arg0, %arg1 : i32, i32
  }
}

module attributes {stable_mosaic.version = 11 : i64} {
  func.func @_linear_kernel(%arg0: i32, %arg1: i32, %arg2: memref<16x32xf32, #tpu.memory_space<vmem>>, %arg3: memref<32x32xf32, #tpu.memory_space<vmem>>, %arg4: memref<1x32xf32, #tpu.memory_space<vmem>>, %arg5: memref<16x32xf32, #tpu.memory_space<vmem>>) attributes {dimension_semantics = [#tpu.dimension_semantics<parallel>, #tpu.dimension_semantics<parallel>], iteration_bounds = array<i64: 1, 1>, scalar_prefetch = 0 : i64, scratch_operands = 0 : i64, tpu.core_type = #tpu.core_type<tc>, window_params = [{transform_indices = @transform_0, window_bounds = array<i64: 16, 32>}, {transform_indices = @transform_1, window_bounds = array<i64: 32, 32>}, {transform_indices = @transform_2, window_bounds = array<i64: 1, 32>}, {transform_indices = @transform_3, window_bounds = array<i64: 16, 32>}]} {
    %c0 = arith.constant 0 : index
    %c0_0 = arith.constant 0 : index
    %0 = vector.load %arg2[%c0, %c0_0] : memref<16x32xf32, #tpu.memory_space<vmem>>, vector<16x32xf32>
    %c0_1 = arith.constant 0 : index
    %c0_2 = arith.constant 0 : index
    %1 = vector.load %arg3[%c0_1, %c0_2] : memref<32x32xf32, #tpu.memory_space<vmem>>, vector<32x32xf32>
    %cst = arith.constant dense<0.000000e+00> : vector<16x32xf32>
    %2 = tpu.matmul %0, %1, %cst {dimension_numbers = #tpu.dot_dimension_numbers<[1], [0], [0], [1], [0, 0, 1, 1], [], []>} : vector<16x32xf32>, vector<32x32xf32>, vector<16x32xf32> -> vector<16x32xf32>
    %c0_3 = arith.constant 0 : index
    %c0_4 = arith.constant 0 : index
    %3 = vector.load %arg4[%c0_3, %c0_4] : memref<1x32xf32, #tpu.memory_space<vmem>>, vector<1x32xf32>
    %4 = vector.broadcast %3 : vector<1x32xf32> to vector<16x32xf32>
    %5 = arith.addf %2, %4 : vector<16x32xf32>
    %c0_5 = arith.constant 0 : index
    %c0_6 = arith.constant 0 : index
    %6 = vector.load %arg5[%c0_5, %c0_6] : memref<16x32xf32, #tpu.memory_space<vmem>>, vector<16x32xf32>
    tpu.vector_store %arg5[%c0_5, %c0_6], %5 {strides = array<i32>} : memref<16x32xf32, #tpu.memory_space<vmem>>, vector<16x32xf32>,
    return
  }
  func.func @transform_0(%arg0: i32, %arg1: i32) -> (i32, i32) {
    %c0_i32 = arith.constant 0 : i32
    %c0_i32_0 = arith.constant 0 : i32
    return %arg0, %c0_i32 : i32, i32
  }
  func.func @transform_1(%arg0: i32, %arg1: i32) -> (i32, i32) {
    %c0_i32 = arith.constant 0 : i32
    %c0_i32_0 = arith.constant 0 : i32
    return %c0_i32, %arg1 : i32, i32
  }
  func.func @transform_2(%arg0: i32, %arg1: i32) -> (i32, i32) {
    %c0_i32 = arith.constant 0 : i32
    %c0_i32_0 = arith.constant 0 : i32
    return %c0_i32, %arg1 : i32, i32
  }
  func.func @transform_3(%arg0: i32, %arg1: i32) -> (i32, i32) {
    %c0_i32 = arith.constant 0 : i32
    return %arg0, %arg1 : i32, i32
  }
}

</mosaic_0001>

<bundles_post_ra>
// kernel: mha_forward.6
= control target key start
LH: loop header
LB: loop body
LE: loop exit
PB: predicated region body
PF: predicated region fallthrough
CT: control target
= control target key end

     0   :  { %8 = vsyncpa [#allocation3], 0  ;;  %s235_s0 = inlined_call_operand.hbm [shape: f32[16,32], index: 0, kind: input, shape index: {}]   ;;  %s236_s1 = inlined_call_operand.hbm [shape: f32[32,32], index: 1, kind: input, shape index: {}]   ;;  %s237_s2 = inlined_call_operand.hbm [shape: f32[1,32], index: 2, kind: input, shape index: {}]   ;;  %s238_s3 = inlined_call_operand.vmem [shape: f32[16,32], index: 3, kind: output, shape index: {}]  }
   0x1   :  { %9 = vsyncpa [#allocation5], 0  ;;  %s27_s14 = sshll.u32 %s236_s1, 4  ;;  %s195_s15 = smov [#allocation4]   ;;  %s28_s14 = int_to_ptr.hbm [resolvable:$true] %s27_s14 }
   0x2   :  { %s29_s16 = sshll.u32 %s195_s15, 4  ;;  %s14_s19 = sshll.u32 %s235_s0, 4  ;;  %s30_s16 = int_to_ptr.vmem [resolvable:$true] %s29_s16  ;;  %s15_s19 = int_to_ptr.hbm [resolvable:$true] %s14_s19 }
   0x3   :  { %s196_s20 = smov 128   ;;  %s197_s21 = smov 8  }
   0x4   :  { %35 = dma.hbm_to_vmem [thread:$0]  %s28_s14, 512, %s30_s16, [#allocation5], %s196_s20, %s196_s20, %s197_s21  }
   0x5   :  { %s198_s22 = smov [#allocation2]   ;;  %s41_s26 = sshll.u32 %s237_s2, 4  ;;  %s42_s26 = int_to_ptr.hbm [resolvable:$true] %s41_s26 }
   0x6   :  { %s16_s23 = sshll.u32 %s198_s22, 4  ;;  %s199_s1 = smov [#allocation6]   ;;  %s17_s23 = int_to_ptr.vmem [resolvable:$true] %s16_s23 }
   0x7   :  { %22 = dma.hbm_to_vmem [thread:$0]  %s15_s19, 256, %s17_s23, [#allocation3], %s196_s20, %s196_s20, %s197_s21  }
   0x8   :  { %s43_s27 = sshll.u32 %s199_s1, 4  ;;  %s44_s27 = int_to_ptr.vmem [resolvable:$true] %s43_s27 }
   0x9   :  { %46 = dma.hbm_to_vmem [thread:$0]  %s42_s26, 16, %s44_s27, [#allocation5]  }
   0xa   :  { %191 = dma.done.wait [#allocation3], 256  }
   0xb   :  { %192 = vsyncadd [#allocation3], 4294967040 }
   0xc   :  { %193 = dma.done.wait [#allocation5], 528  }
   0xd   :  { %194 = vsyncadd [#allocation5], 4294966768  ;;  %v64_v0 = vld [vmem:[#allocation4 + $0x18] sm:$0xff]  ;;  %v63_v1 = vld [vmem:[#allocation4 + $0x10] sm:$0xff]  ;;  %vm69_vm0 = vcmask 261120  }
   0xe   :  { %88 = vmatpush.msra.mxu0 %v64_v0  ;;  %109 = vmatpush.msra.mxu1 %v64_v0  ;;  %v62_v2 = vld [vmem:[#allocation4 + $0x8] sm:$0xff]  ;;  %v61_v3 = vld [vmem:[#allocation4] sm:$0xff]  ;;  %v59_v4 = vld [vmem:[#allocation2] sm:$0xff] }
   0xf   :  { %v60_v5 = vld [vmem:[#allocation2 + $0x8] sm:$0xff]  ;;  %v118_v6 = vld [vmem:[#allocation6] ss:$0 sm:$0xff] }
  0x10   :  { %89 = vmatpush.msra.mxu0 %v63_v1  ;;  %110 = vmatpush.msra.mxu1 %v63_v1 }
  0x12   :  { %90 = vmatpush.msra.mxu0 %v62_v2  ;;  %111 = vmatpush.msra.mxu1 %v62_v2 }
  0x14   :  { %91 = vmatpush.msra.mxu0 %v61_v3  ;;  %112 = vmatpush.msra.mxu1 %v61_v3 }
  0x15   :  { %107 = vmatmul.msk.f32.vlgmr.msra.gmra.mxu0 %vm69_vm0, %v59_v4  ;;  %108 = vmatmul.msk.f32.vlgmr.msra.gmra.mxu1 %vm69_vm0, %v60_v5 }
  0x92   :  { %v93_v7 = vpop.f32.mrf.mxu0  ;;  %v96_v8 = vpop.f32.mrf.mxu1 }
  0x93   :  { %v94_v9 = vadd.f32 %v118_v6, %v93_v7  ;;  %v97_v10 = vadd.f32 %v118_v6, %v96_v8 }
  0x95   :  { %99 = vst.msk [vmem:[%s238_s3] sm:$0xff] %vm69_vm0, %v94_v9 }
  0x96   :  { %100 = vst.msk [vmem:[%s238_s3 + $0x8] sm:$0xff] %vm69_vm0, %v97_v10 }
  0x97   :  { %105 = vsyncpa [#allocation3], 1 }
  0x98   :  { %106 = vsyncpa [#allocation5], 1 }

// kernel: mha_forward.7
= control target key start
LH: loop header
LB: loop body
LE: loop exit
PB: predicated region body
PF: predicated region fallthrough
CT: control target
= control target key end

     0   :  { %8 = vsyncpa [#allocation3], 0  ;;  %s203_s0 = inlined_call_operand.hbm [shape: f32[16,32], index: 0, kind: input, shape index: {}]   ;;  %s204_s1 = inlined_call_operand.vmem [shape: f32[32,32], index: 1, kind: input, shape index: {}]   ;;  %s205_s2 = inlined_call_operand.hbm [shape: f32[1,32], index: 2, kind: input, shape index: {}]   ;;  %s206_s3 = inlined_call_operand.vmem [shape: f32[16,32], index: 3, kind: output, shape index: {}]  }
   0x1   :  { %s14_s14 = sshll.u32 %s203_s0, 4  ;;  %s15_s14 = int_to_ptr.hbm [resolvable:$true] %s14_s14 }
   0x2   :  { %9 = vsyncpa [#allocation5], 0  ;;  %s155_s15 = smov [#allocation2]   ;;  %s30_s19 = sshll.u32 %s205_s2, 4  ;;  %s31_s19 = int_to_ptr.hbm [resolvable:$true] %s30_s19 }
   0x3   :  { %s16_s16 = sshll.u32 %s155_s15, 4  ;;  %s156_s20 = smov 128   ;;  %s17_s16 = int_to_ptr.vmem [resolvable:$true] %s16_s16 }
   0x4   :  { %s157_s21 = smov 8   ;;  %s158_s22 = smov [#allocation4]  }
   0x5   :  { %22 = dma.hbm_to_vmem [thread:$0]  %s15_s14, 256, %s17_s16, [#allocation3], %s156_s20, %s156_s20, %s157_s21  }
   0x6   :  { %s32_s23 = sshll.u32 %s158_s22, 4  ;;  %s33_s23 = int_to_ptr.vmem [resolvable:$true] %s32_s23 }
   0x7   :  { %35 = dma.hbm_to_vmem [thread:$0]  %s31_s19, 16, %s33_s23, [#allocation5]  }
   0x8   :  { %151 = dma.done.wait [#allocation3], 256  }
   0x9   :  { %152 = vsyncadd [#allocation3], 4294967040 }
   0xa   :  { %153 = dma.done.wait [#allocation5], 16  }
   0xb   :  { %154 = vsyncadd [#allocation5], 4294967280  ;;  %v49_v0 = vld [vmem:[%s204_s1 + $0x18] sm:$0xff]  ;;  %v48_v1 = vld [vmem:[%s204_s1 + $0x10] sm:$0xff]  ;;  %vm54_vm0 = vcmask 261120  }
   0xc   :  { %73 = vmatpush.msra.mxu0 %v49_v0  ;;  %94 = vmatpush.msra.mxu1 %v49_v0  ;;  %v47_v2 = vld [vmem:[%s204_s1 + $0x8] sm:$0xff]  ;;  %v46_v3 = vld [vmem:[%s204_s1] sm:$0xff]  ;;  %v102_v6 = vld [vmem:[#allocation4] ss:$0 sm:$0xff] }
   0xd   :  { %v44_v4 = vld [vmem:[#allocation2] sm:$0xff]  ;;  %v45_v5 = vld [vmem:[#allocation2 + $0x8] sm:$0xff] }
   0xe   :  { %74 = vmatpush.msra.mxu0 %v48_v1  ;;  %95 = vmatpush.msra.mxu1 %v48_v1 }
  0x10   :  { %75 = vmatpush.msra.mxu0 %v47_v2  ;;  %96 = vmatpush.msra.mxu1 %v47_v2 }
  0x12   :  { %76 = vmatpush.msra.mxu0 %v46_v3  ;;  %97 = vmatpush.msra.mxu1 %v46_v3 }
  0x13   :  { %92 = vmatmul.msk.f32.vlgmr.msra.gmra.mxu0 %vm54_vm0, %v44_v4  ;;  %93 = vmatmul.msk.f32.vlgmr.msra.gmra.mxu1 %vm54_vm0, %v45_v5 }
  0x90   :  { %v78_v7 = vpop.f32.mrf.mxu0  ;;  %v81_v8 = vpop.f32.mrf.mxu1 }
  0x91   :  { %v79_v9 = vadd.f32 %v102_v6, %v78_v7  ;;  %v82_v10 = vadd.f32 %v102_v6, %v81_v8 }
  0x93   :  { %84 = vst.msk [vmem:[%s206_s3] sm:$0xff] %vm54_vm0, %v79_v9 }
  0x94   :  { %85 = vst.msk [vmem:[%s206_s3 + $0x8] sm:$0xff] %vm54_vm0, %v82_v10 }
  0x95   :  { %90 = vsyncpa [#allocation3], 1 }
  0x96   :  { %91 = vsyncpa [#allocation5], 1 }

// kernel: mha_forward.5
= control target key start
LH: loop header
LB: loop body
LE: loop exit
PB: predicated region body
PF: predicated region fallthrough
CT: control target
= control target key end

     0   :  { %8 = vsyncpa [#allocation3], 0  ;;  %s197_s0 = inlined_call_operand.vmem [shape: f32[16,32], index: 0, kind: input, shape index: {}]   ;;  %s198_s1 = inlined_call_operand.hbm [shape: f32[32,32], index: 1, kind: input, shape index: {}]   ;;  %s199_s2 = inlined_call_operand.hbm [shape: f32[1,32], index: 2, kind: input, shape index: {}]   ;;  %s200_s3 = inlined_call_operand.vmem [shape: f32[16,32], index: 3, kind: output, shape index: {}]  }
   0x1   :  { %s16_s14 = sshll.u32 %s198_s1, 4  ;;  %s17_s14 = int_to_ptr.hbm [resolvable:$true] %s16_s14 }
   0x2   :  { %9 = vsyncpa [#allocation5], 0  ;;  %s155_s15 = smov [#allocation2]   ;;  %s30_s19 = sshll.u32 %s199_s2, 4  ;;  %s31_s19 = int_to_ptr.hbm [resolvable:$true] %s30_s19 }
   0x3   :  { %s18_s16 = sshll.u32 %s155_s15, 4  ;;  %s156_s20 = smov 128   ;;  %s19_s16 = int_to_ptr.vmem [resolvable:$true] %s18_s16 }
   0x4   :  { %s157_s21 = smov 8   ;;  %s158_s22 = smov [#allocation4]  }
   0x5   :  { %24 = dma.hbm_to_vmem [thread:$0]  %s17_s14, 512, %s19_s16, [#allocation3], %s156_s20, %s156_s20, %s157_s21  }
   0x6   :  { %s32_s23 = sshll.u32 %s158_s22, 4  ;;  %s33_s23 = int_to_ptr.vmem [resolvable:$true] %s32_s23 }
   0x7   :  { %35 = dma.hbm_to_vmem [thread:$0]  %s31_s19, 16, %s33_s23, [#allocation5]  }
   0x8   :  { %151 = dma.done.wait [#allocation3], 512  }
   0x9   :  { %152 = vsyncadd [#allocation3], 4294966784 }
   0xa   :  { %153 = dma.done.wait [#allocation5], 16  }
   0xb   :  { %154 = vsyncadd [#allocation5], 4294967280  ;;  %v49_v0 = vld [vmem:[#allocation2 + $0x18] sm:$0xff]  ;;  %v48_v1 = vld [vmem:[#allocation2 + $0x10] sm:$0xff]  ;;  %vm54_vm0 = vcmask 261120  }
   0xc   :  { %73 = vmatpush.msra.mxu0 %v49_v0  ;;  %94 = vmatpush.msra.mxu1 %v49_v0  ;;  %v47_v2 = vld [vmem:[#allocation2 + $0x8] sm:$0xff]  ;;  %v46_v3 = vld [vmem:[#allocation2] sm:$0xff] }
   0xd   :  { %v44_v4 = vld [vmem:[%s197_s0] sm:$0xff]  ;;  %v45_v5 = vld [vmem:[%s197_s0 + $0x8] sm:$0xff] }
   0xe   :  { %74 = vmatpush.msra.mxu0 %v48_v1  ;;  %95 = vmatpush.msra.mxu1 %v48_v1  ;;  %v102_v6 = vld [vmem:[#allocation4] ss:$0 sm:$0xff] }
  0x10   :  { %75 = vmatpush.msra.mxu0 %v47_v2  ;;  %96 = vmatpush.msra.mxu1 %v47_v2 }
  0x12   :  { %76 = vmatpush.msra.mxu0 %v46_v3  ;;  %97 = vmatpush.msra.mxu1 %v46_v3 }
  0x13   :  { %92 = vmatmul.msk.f32.vlgmr.msra.gmra.mxu0 %vm54_vm0, %v44_v4  ;;  %93 = vmatmul.msk.f32.vlgmr.msra.gmra.mxu1 %vm54_vm0, %v45_v5 }
  0x90   :  { %v78_v7 = vpop.f32.mrf.mxu0  ;;  %v81_v8 = vpop.f32.mrf.mxu1 }
  0x91   :  { %v79_v9 = vadd.f32 %v102_v6, %v78_v7  ;;  %v82_v10 = vadd.f32 %v102_v6, %v81_v8 }
  0x93   :  { %84 = vst.msk [vmem:[%s200_s3] sm:$0xff] %vm54_vm0, %v79_v9 }
  0x94   :  { %85 = vst.msk [vmem:[%s200_s3 + $0x8] sm:$0xff] %vm54_vm0, %v82_v10 }
  0x95   :  { %90 = vsyncpa [#allocation3], 1 }
  0x96   :  { %91 = vsyncpa [#allocation5], 1 }

// kernel: mha_forward.8
= control target key start
LH: loop header
LB: loop body
LE: loop exit
PB: predicated region body
PF: predicated region fallthrough
CT: control target
= control target key end

     0   :  { %10 = vsyncpa [#allocation3], 0  ;;  %s1096_s0 = inlined_call_operand.vmem [shape: f32[2,8,32], index: 0, kind: input, shape index: {}]   ;;  %s1097_s1 = inlined_call_operand.vmem [shape: f32[2,8,32], index: 1, kind: input, shape index: {}]   ;;  %s1098_s2 = inlined_call_operand.vmem [shape: f32[2,8,32], index: 2, kind: input, shape index: {}]   ;;  %s1099_s3 = inlined_call_operand.vmem [shape: f32[2,8,32], index: 3, kind: output, shape index: {0}]   ;;  %s1100_s4 = inlined_call_operand.hbm [shape: f32[2,4,8,8], index: 4, kind: output, shape index: {1}]  }
   0x1   :  { %12 = vsyncpa [#allocation3 + $0x1], 0  ;;  %s936_s15 = smov 0   ;;  %s938_s16 = smov 0  }
   0x2   :  { %s940_s17 = smov 0   ;;  %s942_s18 = smov 0  }
   0x3   :  { %s944_s19 = smov 0   ;;  %s946_s20 = smov 0  }
   0x4 LB: > { %s715_s21 = sadd.s32 4294967295, %s902_s20   ;;  %s716_s22 = sadd.s32 4294967294, %s902_s20   ;;  %s902_s20 = sphi %s946_s20, %s18_s20   ;;  %s898_s19 = sphi %s944_s19, %s1107_s19   ;;  %s894_s18 = sphi %s942_s18, %s1106_s18   ;;  %s890_s17 = sphi %s940_s17, %s1105_s17   ;;  %s886_s16 = sphi %s938_s16, %s1104_s16   ;;  %s882_s15 = sphi %s936_s15, %s1103_s15  }
   0x5   : > { %s30_s23 = sadd.s32 1, %s898_s19  ;;  %s147_s24 = sadd.s32 1, %s890_s17 }
   0x6   : > { %p32_p0 = scmp.ge.s32.totalorder %s30_s23, 2  ;;  %p157_p1 = scmp.ne.s32.totalorder %s890_s17, %s886_s16 }
   0x7   : > { %p158_p2 = scmp.eq.s32.totalorder %s715_s21, 1  ;;  %p163_p3 = scmp.ne.s32.totalorder %s886_s16, %s882_s15 }
   0x8   : > { %s1109_s23 = smov (%p32_p0, %s30_s23), 0  ;;  %p164_p5 = scmp.eq.s32.totalorder %s716_s22, 1 }
   0x9   : > { %p976_p4 = por %p158_p2, %p157_p1  ;;  %s142_s26 = ssub.s32 %s898_s19, %s1109_s23 }
   0xa   : > { %p719_p6 = scmp.ge.s32.totalorder %s902_s20, 1  ;;  %p145_p7 = scmp.eq.s32.totalorder %s142_s26, 0 }
   0xb   : > { %p983_p8 = por %p164_p5, %p163_p3  ;;  %p206_p9 = scmp.lt.s32.totalorder %s902_s20, 3 }
   0xc   : > { %s989_s28 = scalar_select %p145_p7, %s890_s17, %s147_s24  }
   0xd   : > { %p207_p10 = pnand %p719_p6, %p206_p9 }
   0xe   : > { %p249_p11 = scmp.lt.s32.totalorder (!%p207_p10), %s894_s18, 1  ;;  %s904_s11 = smov (!%p207_p10), 120  }
   0xf   : > { %210 = sbr.rel (%p207_p10) target bundleno = 1048 (0x418), region = 32  ;;  %s905_s12 = smov (!%p207_p10), 112  }
  0x10   : > { %s906_s13 = smov (!%p207_p10), 104   ;;  %s246_s24 = sand.u32 (!%p207_p10), 1, %s886_s16  }
  0x11   : > { %s720_s26 = sshll.u32 (!%p207_p10), %s246_s24, 5  ;;  %s907_s5 = smov (!%p207_p10), 8  }
  0x12   : > { %s745_s6 = sshll.u32 (!%p207_p10), %s894_s18, 5 }
  0x13   : > { %s581_s9 = scalar_lea.hbm (!%p207_p10), %s1100_s4, %s745_s6 }
  0x14   : > { %s250_s29 = scalar_select %p249_p11, %s894_s18, 1  ;;  %vm275_vm0 = vcmask 64512  }
  0x15   : > { %s844_s18 = scalar_lea.hbm %s1100_s4, 64 }
  0x16   : > { %s993_s30 = sshll.u32 %s250_s29, 3  ;;  %s1028_s29 = scalar_lea.vmem [#allocation2], %s720_s26 }
  0x17   : > { %s259_s7 = scalar_lea.vmem %s1097_s1, %s993_s30  ;;  %s255_s10 = scalar_lea.vmem %s1096_s0, %s993_s30 }
  0x18   : > { %v273_v0 = vld [vmem:[%s259_s7] sm:$0xff]  ;;  %s263_s22 = scalar_lea.vmem %s1098_s2, %s993_s30 }
  0x19   : > { %v271_v1 = vld [vmem:[%s255_s10] sm:$0xff]  ;;  %725 = vmatpush.xpose.msk.msra.mxu0 %vm275_vm0, %v273_v0  ;;  %339 = vrot.lane.b32.xlu1 %v273_v0, %s904_s11  ;;  %s582_s10 = sshll.u32 %s1028_s29, 4  ;;  %s583_s10 = int_to_ptr.vmem [resolvable:$true] %s582_s10 }
  0x1a   : > { %v272_v2 = vmul.f32 0.35355338, %v271_v1  ;;  %407 = vrot.lane.b32.xlu2 %v273_v0, %s905_s12  ;;  %v274_v17 = vld [vmem:[%s263_s22] sm:$0xff] }
  0x1b   : > { %332 = vmatpush.msra.mxu1 %v274_v17 }
  0x1c   : > { %726 = vmatmul.msk.f32.vlgmr.msra.gmra.mxu0 %vm275_vm0, %v272_v2 }
  0x21   : > { %337 = vrot.lane.b32.xlu1 %v272_v2, %s904_s11 }
  0x22   : > { %474 = vrot.lane.b32.xlu2 %v273_v0, %s906_s13 }
  0x29   : > { %472 = vrot.lane.b32.xlu1 %v272_v2, %s906_s13 }
  0x74   : > { %v408_v3 = vpop.permute.xlu2 %407 }
  0x75   : > { %732 = vmatpush.xpose.msk.msrb.mxu1 %vm275_vm0, %v408_v3 }
  0x7c   : > { %v475_v4 = vpop.permute.xlu2 %474 }
  0x7d   : > { %736 = vmatpush.xpose.msk.msrb.mxu0 %vm275_vm0, %v475_v4 }
  0x8b   : > { %v340_v5 = vpop.permute.xlu1 %339 }
  0x8c   : > { %728 = vmatpush.xpose.msk.msra.mxu2 %vm275_vm0, %v340_v5 }
  0x93   : > { %v338_v6 = vpop.permute.xlu1 %337 }
  0x94   : > { %729 = vmatmul.msk.f32.vlgmr.msra.gmra.mxu2 %vm275_vm0, %v338_v6 }
  0x99   : > { %v299_v7 = vpop.f32.mrf.mxu0 }
  0x9a   : > { %v302_v8 = vsel %vm275_vm0, %v299_v7, -inf }
  0x9b   : > { %303 = vmax.xlane.f32.xlu0 %v302_v8  ;;  %v473_v9 = vpop.permute.xlu1 %472 }
  0x9c   : > { %737 = vmatmul.msk.f32.vlgmr.msrb.gmra.mxu0 %vm275_vm0, %v473_v9 }
 0x10e   : > { %v304_v10 = vpop.xlane.xlu0 %303 }
 0x10f   : > { %v305_v11 = vsub.f32 %v299_v7, %v304_v10 }
 0x111   : > { %v306_v12 = vmul.f32 1.442695, %v305_v11 }
 0x113   : > { %808 = vpow2.f32 %v306_v12 }
 0x117   : > { %v362_v13 = vpop.f32.mrf.mxu2 }
 0x118   : > { %v365_v14 = vsel %vm275_vm0, %v362_v13, -inf }
 0x119   : > { %v809_v15 = vpop.eup %808  ;;  %366 = vmax.xlane.f32.xlu2 %v365_v14  ;;  %v497_v18 = vpop.f32.mrf.mxu0 }
 0x11a   : > { %v308_v16 = vsel %vm275_vm0, %v809_v15, 0.0  ;;  %v500_v19 = vsel %vm275_vm0, %v497_v18, -inf }
 0x11b   : > { %309 = vadd.xlane.f32.xlu0 %v308_v16 }
 0x12f   : > { %405 = vrot.lane.b32.xlu0 %v272_v2, %s905_s12 }
 0x159   : > { %501 = vmax.xlane.f32.xlu0 %v500_v19 }
 0x16d   : > { %446 = vrot.lane.b32.xlu0 %v274_v17, %s905_s12  ;;  %s566_s12 = scalar_lea.sflag [#allocation3], %s246_s24 }
 0x18c   : > { %v367_v20 = vpop.xlane.xlu2 %366 }
 0x18d   : > { %v368_v21 = vsub.f32 %v362_v13, %v367_v20 }
 0x18e   : > { %v310_v22 = vpop.xlane.xlu0 %309 }
 0x18f   : > { %810 = vrcp.f32 %v310_v22  ;;  %v369_v23 = vmul.f32 1.442695, %v368_v21 }
 0x191   : > { %812 = vpow2.f32 %v369_v23 }
 0x195   : > { %v811_v24 = vpop.eup %810 }
 0x196   : > { %v312_v25 = vmul.f32 %v811_v24, %v809_v15 }
 0x197   : > { %v813_v26 = vpop.eup %812 }
 0x198   : > { %313 = vst.msk [vmem:[%s1028_s29] sm:$0xff] %vm275_vm0, %v312_v25  ;;  %727 = vmatmul.msk.f32.vlgmr.msra.gmra.mxu1 %vm275_vm0, %v312_v25  ;;  %v371_v27 = vsel %vm275_vm0, %v813_v26, 0.0 }
 0x199   : > { %372 = vadd.xlane.f32.xlu2 %v371_v27 }
 0x1a1   : > { %v406_v28 = vpop.permute.xlu0 %405 }
 0x1a2   : > { %733 = vmatmul.msk.f32.vlgmr.msrb.gmra.mxu1 %vm275_vm0, %v406_v28 }
 0x1cc   : > { %v502_v29 = vpop.xlane.xlu0 %501 }
 0x1cd   : > { %v503_v30 = vsub.f32 %v497_v18, %v502_v29 }
 0x1cf   : > { %v504_v31 = vmul.f32 1.442695, %v503_v30 }
 0x1d1   : > { %814 = vpow2.f32 %v504_v31 }
 0x1d7   : > { %v815_v32 = vpop.eup %814 }
 0x1d8   : > { %v506_v33 = vsel %vm275_vm0, %v815_v32, 0.0 }
 0x1d9   : > { %507 = vadd.xlane.f32.xlu2 %v506_v33 }
 0x1df   : > { %v447_v49 = vpop.permute.xlu0 %446 }
 0x20c   : > { %v373_v34 = vpop.xlane.xlu2 %372 }
 0x20d   : > { %816 = vrcp.f32 %v373_v34 }
 0x213   : > { %v817_v35 = vpop.eup %816 }
 0x214   : > { %v375_v36 = vmul.f32 %v817_v35, %v813_v26 }
 0x215   : > { %v1038_v37 = vpop.f32.mrf.mxu1 }
 0x216   : > { %730 = vst.msk [vmem:[%s1028_s29 + $0x8] sm:$0xff] %vm275_vm0, %v375_v36 }
 0x21f   : > { %v430_v38 = vpop.f32.mrf.mxu1 }
 0x220   : > { %v433_v39 = vsel %vm275_vm0, %v430_v38, -inf }
 0x221   : > { %434 = vmax.xlane.f32.xlu1 %v433_v39 }
 0x23a   : > { %379 = vrot.lane.b32.xlu1 %v274_v17, %s904_s11  ;;  %s584_s11 = sshll.u32 %s581_s9, 4  ;;  %s585_s11 = int_to_ptr.hbm [resolvable:$true] %s584_s11 }
 0x24c   : > { %v508_v40 = vpop.xlane.xlu2 %507 }
 0x24d   : > { %818 = vrcp.f32 %v508_v40 }
 0x253   : > { %v819_v41 = vpop.eup %818 }
 0x254   : > { %v510_v42 = vmul.f32 %v819_v41, %v815_v32 }
 0x256   : > { %738 = vst.msk [vmem:[%s1028_s29 + $0x18] sm:$0xff] %vm275_vm0, %v510_v42 }
 0x294   : > { %v435_v43 = vpop.xlane.xlu1 %434 }
 0x295   : > { %v436_v44 = vsub.f32 %v430_v38, %v435_v43 }
 0x297   : > { %v437_v45 = vmul.f32 1.442695, %v436_v44 }
 0x299   : > { %820 = vpow2.f32 %v437_v45 }
 0x29f   : > { %v821_v46 = vpop.eup %820 }
 0x2a0   : > { %v439_v47 = vsel %vm275_vm0, %v821_v46, 0.0 }
 0x2a1   : > { %440 = vadd.xlane.f32.xlu2 %v439_v47 }
 0x2ac   : > { %v380_v48 = vpop.permute.xlu1 %379 }
 0x2ad   : > { %400 = vmatpush.msra.mxu3 %v380_v48 }
 0x2ae   : > { %731 = vmatmul.msk.f32.vlgmr.msra.gmra.mxu3 %vm275_vm0, %v375_v36 }
 0x2af   : > { %467 = vmatpush.msrb.mxu3 %v447_v49 }
 0x2b9   : > { %513 = vrot.lane.b32.xlu2 %v274_v17, %s906_s13  ;;  %s838_s13 = sshra.s32 %s585_s11, 4  ;;  %s839_s13 = int_to_ptr.hbm [resolvable:$true] %s838_s13 }
 0x2ba   : > { %s840_s14 = scalar_lea.hbm %s839_s13, 32  ;;  %p845_p1 = scmp.lt.s32.totalorder %s839_s13, %s1100_s4 }
 0x2bb   : > { %p841_p12 = scmp.ne.s32.totalorder %s839_s13, %s840_s14  ;;  %p846_p2 = scmp.lt.s32.totalorder %s844_s18, %s840_s14 }
 0x2bd   : > { %p842_p13 = pnand %p841_p12, %p976_p4  ;;  %p847_p3 = por %p846_p2, %p845_p1 }
 0x2bf   : > { %p843_p0 = pneg %p842_p13 }
 0x2c1   : > { %p848_p5 = pnand %p847_p3, %p843_p0 }
 0x314   : > { %v441_v50 = vpop.xlane.xlu2 %440 }
 0x315   : > { %822 = vrcp.f32 %v441_v50 }
 0x31b   : > { %v823_v51 = vpop.eup %822 }
 0x31c   : > { %v514_v52 = vpop.permute.xlu2 %513  ;;  %v443_v53 = vmul.f32 %v823_v51, %v821_v46 }
 0x31d   : > { %534 = vmatpush.msrb.mxu2 %v514_v52 }
 0x31e   : > { %734 = vst.msk [vmem:[%s1028_s29 + $0x10] sm:$0xff] %vm275_vm0, %v443_v53  ;;  %735 = vmatmul.msk.f32.vlgmr.msrb.gmra.mxu3 %vm275_vm0, %v443_v53  ;;  %739 = vmatmul.msk.f32.vlgmr.msrb.gmra.mxu2 %vm275_vm0, %v510_v42 }
 0x331   : > { %v402_v54 = vpop.f32.mrf.mxu3 }
 0x332   : > { %540 = vrot.lane.b32.xlu1 %v402_v54, %s907_s5 }
 0x333   : > { %851 = shalt.err (!%p848_p5)
}
 0x334   : > { %s908_s24 = smov 128   ;;  %s909_s29 = smov 24   ;;  %vm552_vm1 = vcmask 130048   ;;  %vm554_vm2 = vcmask 195584   ;;  %vm556_vm3 = vcmask 261120  }
 0x335   : > { %746 = dma.vmem_to_hbm [thread:$0]  (%p976_p4), %s583_s10, 512, %s585_s11, %s566_s12, %s908_s24, %s908_s24, %s907_s5  }
 0x336   : > { %s910_s6 = smov 16   ;;  %s270_s13 = scalar_lea.vmem %s1099_s3, %s993_s30 }
 0x3a1   : > { %v469_v55 = vpop.f32.mrf.mxu3  ;;  %v536_v56 = vpop.f32.mrf.mxu2 }
 0x3a2   : > { %548 = vrot.lane.b32.xlu1 %v536_v56, %s909_s29  ;;  %544 = vrot.lane.b32.xlu0 %v469_v55, %s910_s6 }
 0x3a4   : > { %v541_v57 = vpop.permute.xlu1 %540 }
 0x3a5   : > { %v551_v58 = vsel %vm275_vm0, %v1038_v37, %v541_v57 }
 0x414   : > { %v549_v59 = vpop.permute.xlu1 %548  ;;  %v545_v60 = vpop.permute.xlu0 %544 }
 0x415   : > { %v553_v61 = vsel %vm552_vm1, %v551_v58, %v545_v60 }
 0x416   : > { %v555_v62 = vsel %vm554_vm2, %v553_v61, %v549_v59 }
 0x417   : > { %557 = vst.msk [vmem:[%s270_s13] sm:$0xff] %vm556_vm3, %v555_v62 }
 0x418 PF: > { %p752_p4 = scmp.ge.s32.totalorder %s902_s20, 2  ;;  %s609_s25 = sand.u32 1, %s882_s15  }
 0x419   : > { %s610_s5 = scalar_lea.sflag [#allocation3], %s609_s25 }
 0x41a   : > { %p749_p6 = pnand %p752_p4, %p983_p8 }
 0x41c   : > { %p750_p7 = pneg %p749_p6 }
 0x41e   : > { %877 = dma.done.wait (%p750_p7), %s610_s5, 512  }
 0x41f   : > { %879 = vsyncadd (%p750_p7), %s610_s5, 4294966784  ;;  %s18_s20 = sadd.s32 1, %s902_s20   ;;  %s1103_s15 = smov %s886_s16 }
 0x420   : > { %p15_p9 = scmp.ge.s32.totalorder %s18_s20, 4   ;;  %s1104_s16 = smov %s890_s17 }
 0x421   : > { %s1105_s17 = smov %s989_s28  ;;  %s1106_s18 = smov %s898_s19 }
 0x422   : > { %s1107_s19 = smov %s1109_s23  ;;  %17 = sbr.rel (!%p15_p9) target bundleno = 4 (0x4), region = 88 }
 0x427   :  { %616 = vsyncpa [#allocation3], 1 }
 0x428   :  { %618 = vsyncpa [#allocation3 + $0x1], 1 }

// kernel: mha_forward.9
= control target key start
LH: loop header
LB: loop body
LE: loop exit
PB: predicated region body
PF: predicated region fallthrough
CT: control target
= control target key end

     0   :  { %s162_s0 = inlined_call_operand.vmem [shape: f32[16,32], index: 0, kind: input, shape index: {}]   ;;  %s163_s1 = inlined_call_operand.vmem [shape: f32[32,32], index: 1, kind: input, shape index: {}]   ;;  %s164_s2 = inlined_call_operand.vmem [shape: f32[1,32], index: 2, kind: input, shape index: {}]   ;;  %s165_s3 = inlined_call_operand.hbm [shape: f32[16,32], index: 3, kind: output, shape index: {}]  }
   0x1   :  { %v20_v0 = vld [vmem:[%s163_s1 + $0x18] sm:$0xff]  ;;  %v19_v1 = vld [vmem:[%s163_s1 + $0x10] sm:$0xff]  ;;  %v18_v2 = vld [vmem:[%s163_s1 + $0x8] sm:$0xff] }
   0x2   :  { %44 = vmatpush.msra.mxu0 %v20_v0  ;;  %77 = vmatpush.msra.mxu1 %v20_v0 }
   0x3   :  { %8 = vsyncpa [#allocation3], 0  ;;  %v17_v3 = vld [vmem:[%s163_s1] sm:$0xff]  ;;  %vm25_vm0 = vcmask 261120   ;;  %v16_v5 = vld [vmem:[%s162_s0 + $0x8] sm:$0xff]  ;;  %s111_s1 = smov [#allocation2]  }
   0x4   :  { %45 = vmatpush.msra.mxu0 %v19_v1  ;;  %78 = vmatpush.msra.mxu1 %v19_v1  ;;  %v15_v4 = vld [vmem:[%s162_s0] sm:$0xff]  ;;  %s61_s26 = sshll.u32 %s111_s1, 4  ;;  %s63_s29 = sshll.u32 %s165_s3, 4  ;;  %s62_s26 = int_to_ptr.vmem [resolvable:$true] %s61_s26  ;;  %s64_s29 = int_to_ptr.hbm [resolvable:$true] %s63_s29 }
   0x5   :  { %v84_v6 = vld [vmem:[%s164_s2] ss:$0 sm:$0xff]  ;;  %s112_s0 = smov 128   ;;  %s113_s30 = smov 8  }
   0x6   :  { %46 = vmatpush.msra.mxu0 %v18_v2  ;;  %79 = vmatpush.msra.mxu1 %v18_v2 }
   0x8   :  { %47 = vmatpush.msra.mxu0 %v17_v3  ;;  %80 = vmatpush.msra.mxu1 %v17_v3 }
   0x9   :  { %75 = vmatmul.msk.f32.vlgmr.msra.gmra.mxu0 %vm25_vm0, %v15_v4  ;;  %76 = vmatmul.msk.f32.vlgmr.msra.gmra.mxu1 %vm25_vm0, %v16_v5 }
  0x86   :  { %v49_v7 = vpop.f32.mrf.mxu0  ;;  %v52_v8 = vpop.f32.mrf.mxu1 }
  0x87   :  { %v50_v9 = vadd.f32 %v84_v6, %v49_v7  ;;  %v53_v10 = vadd.f32 %v84_v6, %v52_v8 }
  0x89   :  { %55 = vst.msk [vmem:[#allocation2] sm:$0xff] %vm25_vm0, %v50_v9 }
  0x8a   :  { %56 = vst.msk [vmem:[#allocation2 + $0x8] sm:$0xff] %vm25_vm0, %v53_v10 }
  0x8b   :  { %69 = dma.vmem_to_hbm [thread:$0]  %s62_s26, 256, %s64_s29, [#allocation3], %s112_s0, %s112_s0, %s113_s30  }
  0x8c   :  { %109 = dma.done.wait [#allocation3], 256  }
  0x8d   :  { %110 = vsyncadd [#allocation3], 4294967040 }
  0x8e   :  { %74 = vsyncpa [#allocation3], 1 }

</bundles_post_ra>
